<compile_context>
chip_gen: v7x
topology: tpu7x:2x2x1
jax: 0.10.0
libtpu: 0.0.40
codegen_flags: <defaults>
</compile_context>

<pallas_src>
import functools
import math

import jax
import jax.numpy as jnp
from jax.experimental import pallas as pl
from jax.experimental.pallas import tpu as pltpu


def _mix_u32(h):
    """Murmur3-style 32-bit finalizer (pure VPU integer ops)."""
    h = h ^ (h >> 16)
    h = h * jnp.uint32(0x7FEB352D)
    h = h ^ (h >> 15)
    h = h * jnp.uint32(0x846CA68B)
    h = h ^ (h >> 16)
    return h


def _posenc_kernel(seed_ref, x_ref, pe_ref, out_ref, *, p, training, batch, s_tile):
    # x_ref:  (S_TILE, B*D) VMEM tile, in x.dtype
    # pe_ref: (S_TILE, D)   VMEM tile, already in x.dtype
    x = x_ref[...]
    pe = pe_ref[...]
    # Broadcast pe across the batch lane-groups: value at flat index b*D + d
    # must be pe[s, d]; jnp.tile along the last axis gives exactly that.
    pe_full = jnp.tile(pe, (1, batch)) if batch > 1 else pe
    y = x + pe_full

    if training and p > 0.0:
        rows, cols = y.shape
        # Counter-based RNG: hash(global element index, seed).  Independent
        # across sequence tiles because the global row offset enters the hash.
        row = jax.lax.broadcasted_iota(jnp.int32, (rows, cols), 0).astype(jnp.uint32)
        col = jax.lax.broadcasted_iota(jnp.int32, (rows, cols), 1).astype(jnp.uint32)
        tile_base = (pl.program_id(0) * s_tile).astype(jnp.uint32)
        ctr = (tile_base + row) * jnp.uint32(cols) + col
        seed = seed_ref[0].astype(jnp.uint32)
        h = _mix_u32(ctr + seed * jnp.uint32(0x9E3779B9))
        # Compare in non-negative int31 space (avoids unsigned-compare quirks).
        u31 = (h >> 1).astype(jnp.int32)
        threshold = jnp.int32(min(int(p * float(2 ** 31)), 2 ** 31 - 1))
        keep = u31 >= threshold               # keep prob = 1 - p
        # Inverted dropout: scale kept values by 1/(1-p).
        scale = jnp.asarray(1.0 / (1.0 - p), dtype=y.dtype)
        y = jnp.where(keep, y * scale, jnp.zeros_like(y))

    out_ref[...] = y.astype(out_ref.dtype)


def make_pe(d_model, max_len=5000, dtype=jnp.float32):
    """Deterministic positional-encoding buffer, same math as __init__."""
    position = jnp.arange(max_len, dtype=jnp.float32)[:, None]
    div_term = jnp.exp(
        jnp.arange(0, d_model, 2, dtype=jnp.float32) * (-math.log(10000.0) / d_model)
    )
    angles = position * div_term                        # (max_len, d_model//2)
    pe = jnp.zeros((max_len, d_model), dtype=jnp.float32)
    pe = pe.at[:, 0::2].set(jnp.sin(angles))
    pe = pe.at[:, 1::2].set(jnp.cos(angles))
    return pe[:, None, :].astype(dtype)                 # (max_len, 1, d_model)


def _choose_s_tile(S, row_bytes, target_bytes=2 << 20):
    """Pick a sequence tile: ~2 MiB x-blocks, multiple of 8 sublanes,
    preferring a divisor of S so no ragged edge block is needed."""
    rows = max(1, target_bytes // max(row_bytes, 1))
    if rows >= S:
        return S
    rows = max(8, (rows // 8) * 8)
    for cand in range(min(rows, S), 7, -8):
        if S % cand == 0:
            return cand
    return min(rows, S)          # ragged last block; Pallas masks the edge


def positional_encoding(x, pe, *, seed=0, p=0.2, training=True):
    S, B, D = x.shape
    assert 0.0 <= p < 1.0, "dropout p must be in [0, 1)"
    x2 = x.reshape(S, B * D)                            # lane-dense contiguous view
    pe2 = pe[:S, 0, :].astype(x.dtype)                  # (S, D), cast once outside
    seed_arr = jnp.array([seed], dtype=jnp.int32)

    row_bytes = B * D * x.dtype.itemsize
    s_tile = _choose_s_tile(S, row_bytes)
    grid = (pl.cdiv(S, s_tile),)

    kernel = functools.partial(
        _posenc_kernel, p=float(p), training=bool(training), batch=B, s_tile=s_tile
    )
    # TODO(synk): optionally pass input_output_aliases={1: 0} when the caller
    # donates x, to avoid a second full-size activation allocation in HBM.
    out2 = pl.pallas_call(
        kernel,
        out_shape=jax.ShapeDtypeStruct((S, B * D), x.dtype),
        grid_spec=pltpu.PrefetchScalarGridSpec(
            num_scalar_prefetch=1,                      # seed lands in SMEM
            grid=grid,
            in_specs=[
                pl.BlockSpec((s_tile, B * D), lambda i, seed: (i, 0)),
                pl.BlockSpec((s_tile, D), lambda i, seed: (i, 0)),
            ],
            out_specs=pl.BlockSpec((s_tile, B * D), lambda i, seed: (i, 0)),
        ),
        compiler_params=pltpu.CompilerParams(
            dimension_semantics=("parallel",)           # megacore split on v7x
        ),
    )(seed_arr, x2, pe2)
    return out2.reshape(S, B, D)


if __name__ == "__main__":
    S, B, D = 8, 2, 32                                  # seq=8, batch=2, d_model=32
    key = jax.random.PRNGKey(0)
    x = jax.random.normal(key, (S, B, D), dtype=jnp.float32)
    pe = make_pe(D, max_len=5000)
    ref = x + pe[:S]

    # Eval mode (dropout = identity): exact vs a pure-JAX reference.
    y_eval = jax.block_until_ready(
        positional_encoding(x, pe, seed=0, p=0.2, training=False)
    )
    assert y_eval.shape == (S, B, D)
    assert jnp.allclose(y_eval, ref, atol=1e-6), "eval-mode mismatch vs reference"

    # Training mode: dropout mask drawn in-kernel from a counter-based hash RNG.
    # TODO(synk): torch's dropout RNG stream cannot be bit-matched; semantics
    # (Bernoulli keep-prob 1-p, 1/(1-p) scaling) are reproduced instead.
    p = 0.2
    y_train = jax.block_until_ready(
        positional_encoding(x, pe, seed=1234, p=p, training=True)
    )
    assert y_train.shape == (S, B, D)
    scaled_ref = ref / (1.0 - p)
    is_dropped = jnp.abs(y_train) < 1e-7
    is_kept_ok = jnp.abs(y_train - scaled_ref) < 1e-4
    assert bool(jnp.all(is_dropped | is_kept_ok)), "training-mode values malformed"
    keep_frac = 1.0 - float(jnp.mean(is_dropped))
    assert 0.5 < keep_frac <= 1.0, f"implausible keep fraction {keep_frac}"

    print("KERNEL_OK")
</pallas_src>

<mosaic_0001>
module attributes {stable_mosaic.version = 11 : i64} {
  func.func @_posenc_kernel(%arg0: i32, %arg1: memref<1xi32, #tpu.memory_space<smem>>, %arg2: memref<8x64xf32, #tpu.memory_space<vmem>>, %arg3: memref<8x32xf32, #tpu.memory_space<vmem>>, %arg4: memref<8x64xf32, #tpu.memory_space<vmem>>) attributes {dimension_semantics = [#tpu.dimension_semantics<parallel>], iteration_bounds = array<i64: 1>, scalar_prefetch = 1 : i64, scratch_operands = 0 : i64, tpu.core_type = #tpu.core_type<tc>, window_params = [{transform_indices = @transform_0, window_bounds = array<i64: 8, 64>}, {transform_indices = @transform_1, window_bounds = array<i64: 8, 32>}, {transform_indices = @transform_2, window_bounds = array<i64: 8, 64>}]} {
    %c0 = arith.constant 0 : index
    %c0_0 = arith.constant 0 : index
    %0 = vector.load %arg2[%c0, %c0_0] : memref<8x64xf32, #tpu.memory_space<vmem>>, vector<8x64xf32>
    %c0_1 = arith.constant 0 : index
    %c0_2 = arith.constant 0 : index
    %1 = vector.load %arg3[%c0_1, %c0_2] : memref<8x32xf32, #tpu.memory_space<vmem>>, vector<8x32xf32>
    %2 = tpu.concatenate %1, %1 in 1 : vector<8x32xf32>, vector<8x32xf32> -> vector<8x64xf32>
    %3 = arith.addf %0, %2 : vector<8x64xf32>
    %c0_3 = arith.constant 0 : index
    %c0_4 = arith.constant 0 : index
    %4 = vector.load %arg4[%c0_3, %c0_4] : memref<8x64xf32, #tpu.memory_space<vmem>>, vector<8x64xf32>
    tpu.vector_store %arg4[%c0_3, %c0_4], %3 {strides = array<i32>} : memref<8x64xf32, #tpu.memory_space<vmem>>, vector<8x64xf32>,
    return
  }
  func.func @transform_0(%arg0: i32, %arg1: memref<1xi32, #tpu.memory_space<smem>>) -> (i32, i32) {
    %c0_i32 = arith.constant 0 : i32
    %c0_i32_0 = arith.constant 0 : i32
    return %arg0, %c0_i32 : i32, i32
  }
  func.func @transform_1(%arg0: i32, %arg1: memref<1xi32, #tpu.memory_space<smem>>) -> (i32, i32) {
    %c0_i32 = arith.constant 0 : i32
    %c0_i32_0 = arith.constant 0 : i32
    return %arg0, %c0_i32 : i32, i32
  }
  func.func @transform_2(%arg0: i32, %arg1: memref<1xi32, #tpu.memory_space<smem>>) -> (i32, i32) {
    %c0_i32 = arith.constant 0 : i32
    %c0_i32_0 = arith.constant 0 : i32
    return %arg0, %c0_i32 : i32, i32
  }
}

</mosaic_0001>

<bundles_post_ra>
// kernel: tpu_custom_call.1
= control target key start
LH: loop header
LB: loop body
LE: loop exit
PB: predicated region body
PF: predicated region fallthrough
CT: control target
= control target key end

     0   :  { %9 = vsyncpa [#allocation5], 0  ;;  %s201_s0 = inlined_call_operand.<no memory space> [shape: s32[1], index: 0, kind: input, shape index: {}]   ;;  %s202_s1 = inlined_call_operand.hbm [shape: f32[8,64], index: 1, kind: input, shape index: {}]   ;;  %s203_s2 = inlined_call_operand.hbm [shape: f32[8,32], index: 2, kind: input, shape index: {}]   ;;  %s204_s3 = inlined_call_operand.hbm [shape: f32[8,64], index: 3, kind: output, shape index: {}]  }
   0x1   :  { %10 = vsyncpa [#allocation8], 0 }
   0x2   :  { %11 = vsyncpa [#allocation6], 0  ;;  %s141_s12 = smov [#allocation4]   ;;  %s142_s14 = smov [#allocation7]  }
   0x3   :  { %s18_s13 = sshll.u32 %s141_s12, 4  ;;  %s28_s15 = sshll.u32 %s142_s14, 4  ;;  %s19_s13 = int_to_ptr.vmem [resolvable:$true] %s18_s13  ;;  %s29_s15 = int_to_ptr.vmem [resolvable:$true] %s28_s15 }
   0x4   :  { %s69_s17 = scalar_lea.hbm %s202_s1, 128 }
   0x5   :  { %p70_p0 = scmp.ne.s32.totalorder %s202_s1, %s69_s17  ;;  %p73_p1 = scmp.lt.u32.totalorder %s69_s17, %s202_s1 }
   0x7   :  { %p75_p2 = pnand %p73_p1, %p70_p0 }
   0x9   :  { %78 = shalt.err (!%p75_p2)
}
   0xa   :  { %s79_s22 = scalar_lea.vmem %s19_s13, 128  ;;  %p84_p4 = scmp.lt.s32.totalorder %s19_s13, %s19_s13 }
   0xb   :  { %p80_p3 = scmp.ne.s32.totalorder %s19_s13, %s79_s22  ;;  %p85_p5 = scmp.lt.s32.totalorder %s79_s22, %s79_s22 }
   0xd   :  { %p86_p6 = por %p85_p5, %p84_p4 }
   0xf   :  { %p87_p7 = pnand %p86_p6, %p80_p3 }
  0x11   :  { %90 = shalt.err (!%p87_p7)
}
  0x12   :  { %21 = dma.hbm_to_vmem [thread:$0]  %s202_s1, 128, %s19_s13, [#allocation5]  }
  0x13   :  { %s91_s27 = scalar_lea.hbm %s203_s2, 128 }
  0x14   :  { %p92_p8 = scmp.ne.s32.totalorder %s203_s2, %s91_s27  ;;  %p95_p9 = scmp.lt.u32.totalorder %s91_s27, %s203_s2 }
  0x16   :  { %p97_p10 = pnand %p95_p9, %p92_p8 }
  0x18   :  { %100 = shalt.err (!%p97_p10)
}
  0x19   :  { %s101_s5 = scalar_lea.vmem %s29_s15, 128  ;;  %p106_p12 = scmp.lt.s32.totalorder %s29_s15, %s29_s15 }
  0x1a   :  { %p102_p11 = scmp.ne.s32.totalorder %s29_s15, %s101_s5  ;;  %p107_p13 = scmp.lt.s32.totalorder %s101_s5, %s101_s5 }
  0x1c   :  { %p108_p0 = por %p107_p13, %p106_p12 }
  0x1e   :  { %p109_p1 = pnand %p108_p0, %p102_p11 }
  0x20   :  { %112 = shalt.err (!%p109_p1)
}
  0x21   :  { %31 = dma.hbm_to_vmem [thread:$0]  %s203_s2, 128, %s29_s15, [#allocation8]  }
  0x22   :  { %135 = dma.done.wait [#allocation5], 128  }
  0x23   :  { %136 = vsyncadd [#allocation5], 4294967168 }
  0x24   :  { %137 = dma.done.wait [#allocation8], 128  }
  0x25   :  { %138 = vsyncadd [#allocation8], 4294967168  ;;  %v39_v0 = vld [vmem:[#allocation7] sm:$0xff]  ;;  %s143_s7 = smov 32   ;;  %vm44_vm0 = vcmask 261120   ;;  %v38_v1 = vld [vmem:[#allocation4] sm:$0xff] }
  0x26   :  { %41 = vrot.lane.b32.xlu0 %v39_v0, %s143_s7  ;;  %s144_s8 = smov [#allocation9]   ;;  %vm47_vm1 = vcmask 523264  }
  0x27   :  { %s55_s9 = sshll.u32 %s144_s8, 4  ;;  %s56_s9 = int_to_ptr.vmem [resolvable:$true] %s55_s9 }
  0x28   :  { %s113_s10 = scalar_lea.vmem %s56_s9, 128  ;;  %p118_p3 = scmp.lt.s32.totalorder %s56_s9, %s56_s9 }
  0x29   :  { %p114_p2 = scmp.ne.s32.totalorder %s56_s9, %s113_s10  ;;  %p119_p4 = scmp.lt.s32.totalorder %s113_s10, %s113_s10 }
  0x2b   :  { %p120_p5 = por %p119_p4, %p118_p3 }
  0x2d   :  { %p121_p6 = pnand %p120_p5, %p114_p2 }
  0x98   :  { %v42_v2 = vpop.permute.xlu0 %41 }
  0x99   :  { %v45_v3 = vsel %vm44_vm0, %v39_v0, %v42_v2 }
  0x9a   :  { %v46_v4 = vadd.f32 %v45_v3, %v38_v1 }
  0x9c   :  { %48 = vst.msk [vmem:[#allocation9] sm:$0xff] %vm47_vm1, %v46_v4 }
  0x9d   :  { %124 = shalt.err (!%p121_p6)
}
  0x9e   :  { %s125_s12 = scalar_lea.hbm %s204_s3, 128 }
  0x9f   :  { %p126_p7 = scmp.ne.s32.totalorder %s204_s3, %s125_s12  ;;  %p129_p8 = scmp.lt.u32.totalorder %s125_s12, %s204_s3 }
  0xa1   :  { %p131_p9 = pnand %p129_p8, %p126_p7 }
  0xa3   :  { %134 = shalt.err (!%p131_p9)
}
  0xa4   :  { %58 = dma.vmem_to_hbm [thread:$0]  %s56_s9, 128, %s204_s3, [#allocation6]  }
  0xa5   :  { %139 = dma.done.wait [#allocation6], 128  }
  0xa6   :  { %140 = vsyncadd [#allocation6], 4294967168 }
  0xa7   :  { %62 = vsyncpa [#allocation5], 1 }
  0xa8   :  { %63 = vsyncpa [#allocation8], 1 }
  0xa9   :  { %64 = vsyncpa [#allocation6], 1 }

</bundles_post_ra>
